<compile_context>
chip_gen: v6e
topology: v6e:2x2x1
jax: 0.10.0
libtpu: 0.0.40
codegen_flags: <defaults>
</compile_context>

<pallas_src>
import jax
import jax.numpy as jnp
from jax.experimental import pallas as pl
from jax.experimental.pallas import tpu as pltpu

N, CIN, H, W = 2, 3, 16, 16
COUT, KH, KW = 64, 3, 3
OH, OW = H - KH + 1, W - KW + 1          # valid conv, stride 1 -> 14 x 14
M = N * OH * OW                          # 392
M_PAD = 512                              # pad M to a multiple of 128 (lane-dense output)
K_RAW = KH * KW * CIN + 1                # 27 taps + 1 bias column = 28
K_PAD = 32                               # pad K to sublane-friendly 32


def conv_matmul_kernel(w_ref, p_ref, o_ref):
    # w_ref: (COUT, K_PAD)   = (64, 32)   weights (+ bias col, zero pad)
    # p_ref: (K_PAD, M_PAD)  = (32, 512)  transposed im2col patches (+ ones row, zero pads)
    # o_ref: (COUT, M_PAD)   = (64, 512)  lane-dense output (512 % 128 == 0 -> unmasked vst)
    o_ref[...] = jnp.dot(
        w_ref[...], p_ref[...], preferred_element_type=jnp.float32
    ).astype(o_ref.dtype)


def prepare_conv_weights(weight, bias):
    """Hoisted, once-per-layer parameter prep.

    weight: (COUT, CIN, KH, KW) f32 (PyTorch OIHW); bias: (COUT,) f32.
    Returns the (COUT, K_PAD) matmul LHS with K ordering (cin, kh, kw),
    bias folded in as an extra column, zero-padded to K_PAD.
    """
    w2d = weight.reshape(COUT, CIN * KH * KW)                       # (64, 27), order (cin,kh,kw)
    w_mat = jnp.concatenate(
        [w2d, bias.reshape(COUT, 1),
         jnp.zeros((COUT, K_PAD - K_RAW), dtype=weight.dtype)], axis=1)  # (64, 32)
    return w_mat


@jax.jit
def mrp_forward(x_nchw, w_mat):
    """x_nchw: (N, 3, H, W) f32; w_mat: prepared (64, 32) weight matrix.
    Returns (N, 64, OH, OW) f32, matching nn.Conv2d(3, 64, kernel_size=3)(x)."""
    # ---- im2col, built directly in transposed (K, M) layout ----
    # taps: for each (kh, kw) a (N, CIN, OH, OW) slice of the input.
    taps = [x_nchw[:, :, kh:kh + OH, kw:kw + OW]
            for kh in range(KH) for kw in range(KW)]
    p = jnp.stack(taps, axis=0)                                      # (9, N, CIN, OH, OW)
    p = jnp.transpose(p, (2, 0, 1, 3, 4))                            # (CIN, 9, N, OH, OW) - leading axes only
    p_t = p.reshape(CIN * KH * KW, M)                                # (27, 392), K order (cin,kh,kw)
    # fold bias (ones row), zero-pad K 28 -> 32 and M 392 -> 512.
    p_t = jnp.concatenate(
        [p_t, jnp.ones((1, M), dtype=p_t.dtype),
         jnp.zeros((K_PAD - K_RAW, M), dtype=p_t.dtype)], axis=0)    # (32, 392)
    p_t = jnp.concatenate(
        [p_t, jnp.zeros((K_PAD, M_PAD - M), dtype=p_t.dtype)], axis=1)  # (32, 512)

    out = pl.pallas_call(
        conv_matmul_kernel,
        out_shape=jax.ShapeDtypeStruct((COUT, M_PAD), jnp.float32),
        in_specs=[
            pl.BlockSpec(memory_space=pltpu.MemorySpace.VMEM),
            pl.BlockSpec(memory_space=pltpu.MemorySpace.VMEM),
        ],
        out_specs=pl.BlockSpec(memory_space=pltpu.MemorySpace.VMEM),
        cost_estimate=pl.CostEstimate(
            flops=2 * COUT * K_PAD * M_PAD,
            transcendentals=0,
            bytes_accessed=4 * (COUT * K_PAD + K_PAD * M_PAD + COUT * M_PAD)),
    )(w_mat, p_t)                                                    # (64, 512)

    out = out[:, :M].reshape(COUT, N, OH, OW)                        # drop M padding
    # leading-axes permutation only -> (OH, OW) minor dims stay contiguous
    return jnp.transpose(out, (1, 0, 2, 3))                          # (N, COUT, OH, OW)


if __name__ == "__main__":
    key = jax.random.PRNGKey(0)
    kx, kw, kb = jax.random.split(key, 3)

    # Deterministic synthetic parameters (shapes from nn.Conv2d(3, 64, 3)).
    fan_in = CIN * KH * KW
    bound = 1.0 / (fan_in ** 0.5)
    weight = jax.random.uniform(kw, (COUT, CIN, KH, KW), jnp.float32,
                                minval=-bound, maxval=bound)
    bias = jax.random.uniform(kb, (COUT,), jnp.float32,
                              minval=-bound, maxval=bound)

    x = jax.random.normal(kx, (N, CIN, H, W), dtype=jnp.float32)

    # Once-per-layer parameter prep (hoisted out of the forward path).
    w_mat = jax.block_until_ready(prepare_conv_weights(weight, bias))

    out = mrp_forward(x, w_mat)
    out = jax.block_until_ready(out)

    # Sanity check against XLA's conv (f32 path -> tight tolerance holds).
    ref = jax.lax.conv_general_dilated(
        x, weight, window_strides=(1, 1), padding="VALID",
        dimension_numbers=("NCHW", "OIHW", "NCHW")) + bias.reshape(1, COUT, 1, 1)
    assert out.shape == (N, COUT, OH, OW)
    assert jnp.allclose(out, ref, atol=1e-4, rtol=1e-4)

    print("KERNEL_OK")
</pallas_src>

<mosaic_0001>
module attributes {stable_mosaic.version = 11 : i64} {
  func.func @conv_matmul_kernel(%arg0: memref<64x32xf32, #tpu.memory_space<vmem>>, %arg1: memref<32x512xf32, #tpu.memory_space<vmem>>, %arg2: memref<64x512xf32, #tpu.memory_space<vmem>>) attributes {dimension_semantics = [], scalar_prefetch = 0 : i64, scratch_operands = 0 : i64, tpu.core_type = #tpu.core_type<tc>} {
    %c0 = arith.constant 0 : index
    %c0_0 = arith.constant 0 : index
    %0 = vector.load %arg0[%c0, %c0_0] : memref<64x32xf32, #tpu.memory_space<vmem>>, vector<64x32xf32>
    %c0_1 = arith.constant 0 : index
    %c0_2 = arith.constant 0 : index
    %1 = vector.load %arg1[%c0_1, %c0_2] : memref<32x512xf32, #tpu.memory_space<vmem>>, vector<32x512xf32>
    %cst = arith.constant dense<0.000000e+00> : vector<64x512xf32>
    %2 = tpu.matmul %0, %1, %cst {dimension_numbers = #tpu.dot_dimension_numbers<[1], [0], [0], [1], [0, 0, 1, 1], [], []>} : vector<64x32xf32>, vector<32x512xf32>, vector<64x512xf32> -> vector<64x512xf32>
    %c0_3 = arith.constant 0 : index
    %c0_4 = arith.constant 0 : index
    %3 = vector.load %arg2[%c0_3, %c0_4] : memref<64x512xf32, #tpu.memory_space<vmem>>, vector<64x512xf32>
    tpu.vector_store %arg2[%c0_3, %c0_4], %2 {strides = array<i32>} : memref<64x512xf32, #tpu.memory_space<vmem>>, vector<64x512xf32>,
    return
  }
}

</mosaic_0001>

<bundles_post_ra>
// kernel: mrp_forward.1
= control target key start
LH: loop header
LB: loop body
LE: loop exit
PB: predicated region body
PF: predicated region fallthrough
CT: control target
= control target key end

     0   :  { %v339_v3 = vmov 0.0   ;;  %vm35_vm0 = vcmask 261120   ;;  %s555_s1 = inlined_call_operand.vmem [shape: f32[32,512], index: 1, kind: input, shape index: {}]   ;;  %s556_s0 = inlined_call_operand.vmem [shape: f32[64,32], index: 0, kind: input, shape index: {}]   ;;  %s557_s2 = inlined_call_operand.vmem [shape: f32[64,512], index: 2, kind: output, shape index: {}]  }
   0x1   :  { %v32_v0 = vld [vmem:[%s555_s1 + $0x68] sm:$0xff]  ;;  %v34_v1 = vld [vmem:[%s555_s1 + $0x78] sm:$0xff]  ;;  %v31_v2 = vld [vmem:[%s555_s1 + $0x60] sm:$0xff]  ;;  %124 = vmatprep.mubr.f32.mxu0 %v339_v3  ;;  %237 = vmatprep.mubr.f32.mxu1 %v339_v3 }
   0x2   :  { %84 = vmatprep.subr.mxu0 %v32_v0  ;;  %197 = vmatprep.subr.mxu1 %v34_v1  ;;  %v33_v4 = vld [vmem:[%s555_s1 + $0x70] sm:$0xff]  ;;  %v28_v5 = vld [vmem:[%s555_s1 + $0x48] sm:$0xff]  ;;  %v30_v6 = vld [vmem:[%s555_s1 + $0x58] sm:$0xff] }
   0x3   :  { %85 = vmatpush1.msra.mxu0 %v31_v2  ;;  %198 = vmatpush1.msra.mxu1 %v33_v4  ;;  %v27_v7 = vld [vmem:[%s555_s1 + $0x40] sm:$0xff]  ;;  %v29_v8 = vld [vmem:[%s555_s1 + $0x50] sm:$0xff]  ;;  %v24_v9 = vld [vmem:[%s555_s1 + $0x28] sm:$0xff] }
   0x4   :  { %86 = vmatprep.subr.mxu0 %v28_v5  ;;  %199 = vmatprep.subr.mxu1 %v30_v6  ;;  %v26_v10 = vld [vmem:[%s555_s1 + $0x38] sm:$0xff]  ;;  %v23_v11 = vld [vmem:[%s555_s1 + $0x20] sm:$0xff]  ;;  %v25_v12 = vld [vmem:[%s555_s1 + $0x30] sm:$0xff] }
   0x5   :  { %87 = vmatpush1.msra.mxu0 %v27_v7  ;;  %200 = vmatpush1.msra.mxu1 %v29_v8  ;;  %v20_v13 = vld [vmem:[%s555_s1 + $0x8] sm:$0xff]  ;;  %v22_v14 = vld [vmem:[%s555_s1 + $0x18] sm:$0xff]  ;;  %v19_v15 = vld [vmem:[%s555_s1] sm:$0xff] }
   0x6   :  { %88 = vmatprep.subr.mxu0 %v24_v9  ;;  %201 = vmatprep.subr.mxu1 %v26_v10  ;;  %v21_v16 = vld [vmem:[%s555_s1 + $0x10] sm:$0xff]  ;;  %v11_v17 = vld [vmem:[%s556_s0] sm:$0xff]  ;;  %v12_v18 = vld [vmem:[%s556_s0 + $0x8] sm:$0xff] }
   0x7   :  { %89 = vmatpush1.msra.mxu0 %v23_v11  ;;  %202 = vmatpush1.msra.mxu1 %v25_v12  ;;  %v13_v19 = vld [vmem:[%s556_s0 + $0x10] sm:$0xff]  ;;  %v14_v20 = vld [vmem:[%s556_s0 + $0x18] sm:$0xff]  ;;  %v15_v21 = vld [vmem:[%s556_s0 + $0x20] sm:$0xff] }
   0x8   :  { %90 = vmatprep.subr.mxu0 %v20_v13  ;;  %203 = vmatprep.subr.mxu1 %v22_v14  ;;  %v16_v22 = vld [vmem:[%s556_s0 + $0x28] sm:$0xff]  ;;  %v17_v23 = vld [vmem:[%s556_s0 + $0x30] sm:$0xff]  ;;  %v18_v24 = vld [vmem:[%s556_s0 + $0x38] sm:$0xff] }
   0x9   :  { %91 = vmatpush1.msra.mxu0 %v19_v15  ;;  %204 = vmatpush1.msra.mxu1 %v21_v16 }
   0xa   :  { %322 = vmatmul.mubr.msk.f32.vlgmr.msra.gmra.mxu0 %vm35_vm0, %v11_v17  ;;  %330 = vmatmul.mubr.msk.f32.vlgmr.msra.gmra.mxu1 %vm35_vm0, %v11_v17 }
   0xb   :  { %130 = vmatprep.mubr.f32.mxu0 %v339_v3  ;;  %243 = vmatprep.mubr.f32.mxu1 %v339_v3 }
   0xe   :  { %323 = vmatmul.mubr.msk.f32.gmra.mxu0 %vm35_vm0, %v12_v18  ;;  %331 = vmatmul.mubr.msk.f32.gmra.mxu1 %vm35_vm0, %v12_v18 }
   0xf   :  { %136 = vmatprep.mubr.f32.mxu0 %v339_v3  ;;  %249 = vmatprep.mubr.f32.mxu1 %v339_v3 }
  0x12   :  { %324 = vmatmul.mubr.msk.f32.gmra.mxu0 %vm35_vm0, %v13_v19  ;;  %332 = vmatmul.mubr.msk.f32.gmra.mxu1 %vm35_vm0, %v13_v19 }
  0x13   :  { %142 = vmatprep.mubr.f32.mxu0 %v339_v3  ;;  %255 = vmatprep.mubr.f32.mxu1 %v339_v3 }
  0x16   :  { %325 = vmatmul.mubr.msk.f32.gmra.mxu0 %vm35_vm0, %v14_v20  ;;  %333 = vmatmul.mubr.msk.f32.gmra.mxu1 %vm35_vm0, %v14_v20 }
  0x17   :  { %148 = vmatprep.mubr.f32.mxu0 %v339_v3  ;;  %261 = vmatprep.mubr.f32.mxu1 %v339_v3 }
  0x1a   :  { %326 = vmatmul.mubr.msk.f32.gmra.mxu0 %vm35_vm0, %v15_v21  ;;  %334 = vmatmul.mubr.msk.f32.gmra.mxu1 %vm35_vm0, %v15_v21 }
  0x1b   :  { %154 = vmatprep.mubr.f32.mxu0 %v339_v3  ;;  %267 = vmatprep.mubr.f32.mxu1 %v339_v3 }
  0x1e   :  { %327 = vmatmul.mubr.msk.f32.gmra.mxu0 %vm35_vm0, %v16_v22  ;;  %335 = vmatmul.mubr.msk.f32.gmra.mxu1 %vm35_vm0, %v16_v22 }
  0x1f   :  { %160 = vmatprep.mubr.f32.mxu0 %v339_v3  ;;  %273 = vmatprep.mubr.f32.mxu1 %v339_v3 }
  0x22   :  { %328 = vmatmul.mubr.msk.f32.gmra.mxu0 %vm35_vm0, %v17_v23  ;;  %336 = vmatmul.mubr.msk.f32.gmra.mxu1 %vm35_vm0, %v17_v23 }
  0x23   :  { %166 = vmatprep.mubr.f32.mxu0 %v339_v3  ;;  %279 = vmatprep.mubr.f32.mxu1 %v339_v3 }
  0x26   :  { %329 = vmatmul.mubr.msk.f32.gmra.mxu0 %vm35_vm0, %v18_v24  ;;  %337 = vmatmul.mubr.msk.f32.gmra.mxu1 %vm35_vm0, %v18_v24 }
  0xca   :  { %v126_v25 = vpop.f32.mrf.mxu0  ;;  %v239_v26 = vpop.f32.mrf.mxu1 }
  0xcb   :  { %286 = vst [vmem:[%s557_s2] sm:$0xff] %v126_v25  ;;  %288 = vst [vmem:[%s557_s2 + $0x10] sm:$0xff] %v239_v26 }
  0xcc   :  { %v128_v27 = vpop.f32.mrf.mxu0  ;;  %v241_v28 = vpop.f32.mrf.mxu1 }
  0xcd   :  { %287 = vst [vmem:[%s557_s2 + $0x8] sm:$0xff] %v128_v27  ;;  %289 = vst [vmem:[%s557_s2 + $0x18] sm:$0xff] %v241_v28 }
  0xce   :  { %v132_v29 = vpop.f32.mrf.mxu0  ;;  %v245_v30 = vpop.f32.mrf.mxu1 }
  0xcf   :  { %290 = vst [vmem:[%s557_s2 + $0x20] sm:$0xff] %v132_v29  ;;  %292 = vst [vmem:[%s557_s2 + $0x30] sm:$0xff] %v245_v30 }
  0xd0   :  { %v134_v31 = vpop.f32.mrf.mxu0  ;;  %v247_v32 = vpop.f32.mrf.mxu1 }
  0xd1   :  { %291 = vst [vmem:[%s557_s2 + $0x28] sm:$0xff] %v134_v31  ;;  %293 = vst [vmem:[%s557_s2 + $0x38] sm:$0xff] %v247_v32 }
  0xd2   :  { %v138_v33 = vpop.f32.mrf.mxu0  ;;  %v251_v34 = vpop.f32.mrf.mxu1 }
  0xd3   :  { %294 = vst [vmem:[%s557_s2 + $0x40] sm:$0xff] %v138_v33  ;;  %296 = vst [vmem:[%s557_s2 + $0x50] sm:$0xff] %v251_v34 }
  0xd4   :  { %v140_v35 = vpop.f32.mrf.mxu0  ;;  %v253_v36 = vpop.f32.mrf.mxu1 }
  0xd5   :  { %295 = vst [vmem:[%s557_s2 + $0x48] sm:$0xff] %v140_v35  ;;  %297 = vst [vmem:[%s557_s2 + $0x58] sm:$0xff] %v253_v36 }
  0xd6   :  { %v144_v37 = vpop.f32.mrf.mxu0  ;;  %v257_v38 = vpop.f32.mrf.mxu1 }
  0xd7   :  { %298 = vst [vmem:[%s557_s2 + $0x60] sm:$0xff] %v144_v37  ;;  %300 = vst [vmem:[%s557_s2 + $0x70] sm:$0xff] %v257_v38 }
  0xd8   :  { %v146_v39 = vpop.f32.mrf.mxu0  ;;  %v259_v40 = vpop.f32.mrf.mxu1 }
  0xd9   :  { %299 = vst [vmem:[%s557_s2 + $0x68] sm:$0xff] %v146_v39  ;;  %301 = vst [vmem:[%s557_s2 + $0x78] sm:$0xff] %v259_v40 }
  0xda   :  { %v150_v41 = vpop.f32.mrf.mxu0  ;;  %v263_v42 = vpop.f32.mrf.mxu1 }
  0xdb   :  { %302 = vst [vmem:[%s557_s2 + $0x80] sm:$0xff] %v150_v41  ;;  %304 = vst [vmem:[%s557_s2 + $0x90] sm:$0xff] %v263_v42 }
  0xdc   :  { %v152_v43 = vpop.f32.mrf.mxu0  ;;  %v265_v44 = vpop.f32.mrf.mxu1 }
  0xdd   :  { %303 = vst [vmem:[%s557_s2 + $0x88] sm:$0xff] %v152_v43  ;;  %305 = vst [vmem:[%s557_s2 + $0x98] sm:$0xff] %v265_v44 }
  0xde   :  { %v156_v45 = vpop.f32.mrf.mxu0  ;;  %v269_v46 = vpop.f32.mrf.mxu1 }
  0xdf   :  { %306 = vst [vmem:[%s557_s2 + $0xa0] sm:$0xff] %v156_v45  ;;  %308 = vst [vmem:[%s557_s2 + $0xb0] sm:$0xff] %v269_v46 }
  0xe0   :  { %v158_v47 = vpop.f32.mrf.mxu0  ;;  %v271_v48 = vpop.f32.mrf.mxu1 }
  0xe1   :  { %307 = vst [vmem:[%s557_s2 + $0xa8] sm:$0xff] %v158_v47  ;;  %309 = vst [vmem:[%s557_s2 + $0xb8] sm:$0xff] %v271_v48 }
  0xe2   :  { %v162_v49 = vpop.f32.mrf.mxu0  ;;  %v275_v50 = vpop.f32.mrf.mxu1 }
  0xe3   :  { %310 = vst [vmem:[%s557_s2 + $0xc0] sm:$0xff] %v162_v49  ;;  %312 = vst [vmem:[%s557_s2 + $0xd0] sm:$0xff] %v275_v50 }
  0xe4   :  { %v164_v51 = vpop.f32.mrf.mxu0  ;;  %v277_v52 = vpop.f32.mrf.mxu1 }
  0xe5   :  { %311 = vst [vmem:[%s557_s2 + $0xc8] sm:$0xff] %v164_v51  ;;  %313 = vst [vmem:[%s557_s2 + $0xd8] sm:$0xff] %v277_v52 }
  0xe6   :  { %v168_v53 = vpop.f32.mrf.mxu0  ;;  %v281_v54 = vpop.f32.mrf.mxu1 }
  0xe7   :  { %314 = vst [vmem:[%s557_s2 + $0xe0] sm:$0xff] %v168_v53  ;;  %316 = vst [vmem:[%s557_s2 + $0xf0] sm:$0xff] %v281_v54 }
  0xe8   :  { %v170_v55 = vpop.f32.mrf.mxu0  ;;  %v283_v56 = vpop.f32.mrf.mxu1 }
  0xe9   :  { %315 = vst [vmem:[%s557_s2 + $0xe8] sm:$0xff] %v170_v55  ;;  %317 = vst [vmem:[%s557_s2 + $0xf8] sm:$0xff] %v283_v56 }

</bundles_post_ra>
